<compile_context>
chip_gen: v7x
topology: tpu7x:2x2x1
jax: 0.10.0
libtpu: 0.0.40
codegen_flags: <defaults>
</compile_context>

<pallas_src>
import numpy as np
import jax
import jax.numpy as jnp
from jax.experimental import pallas as pl
from jax.experimental.pallas import tpu as pltpu


def _bilinear_matrix_1d(out_len: int, in_len: int) -> np.ndarray:
    """Interpolation matrix for align_corners=True bilinear resize (1-D)."""
    W = np.zeros((out_len, in_len), dtype=np.float32)
    if out_len == 1 or in_len == 1:
        W[:, 0] = 1.0
        return W
    scale = (in_len - 1) / (out_len - 1)
    for i in range(out_len):
        x = i * scale
        i0 = int(np.floor(x))
        i0 = min(i0, in_len - 1)
        i1 = min(i0 + 1, in_len - 1)
        frac = x - i0
        W[i, i0] += 1.0 - frac
        W[i, i1] += frac
    return W


def _build_w_full(num_in_tokens: int, Num: int) -> np.ndarray:
    """(S*S+1, N+1) matrix: identity on class token, kron bilinear on patches."""
    N = num_in_tokens - 1
    s = int(np.sqrt(N))
    S = int(np.sqrt(Num - 1))
    assert s * s == N and S * S == Num - 1
    w1d = _bilinear_matrix_1d(S, s)                 # (S, s)
    w2d = np.kron(w1d, w1d).astype(np.float32)      # (S*S, s*s)
    w_full = np.zeros((S * S + 1, N + 1), dtype=np.float32)
    w_full[0, 0] = 1.0
    w_full[1:, 1:] = w2d
    return w_full


def _tran_up_kernel(w_ref, t_ref, o_ref):
    # w_ref: (out_tokens, Nt)   t_ref: (Nt, lane)   o_ref: (out_tokens, lane)
    x = t_ref[...]
    if x.dtype != w_ref.dtype:
        x = x.astype(w_ref.dtype)      # bf16 activations: promote, f32 accumulate
    o_ref[...] = jnp.dot(
        w_ref[...], x, preferred_element_type=jnp.float32
    ).astype(o_ref.dtype)


def _pick_chunk(total: int, candidates) -> int:
    """Largest candidate that evenly divides total, else the full extent."""
    for cand in candidates:
        if total % cand == 0:
            return cand
    return total


def tran_up(t_all: jax.Array, Num: int) -> jax.Array:
    B, Nt, C = t_all.shape
    out_tokens = Num

    # Exact bilinear weights: always f32 (tiny, grid-invariant, HBM-bound kernel).
    w = jnp.asarray(_build_w_full(Nt, Num), dtype=jnp.float32)   # (out_tokens, Nt)

    flops = 2 * out_tokens * Nt * B * C
    bytes_accessed = (
        t_all.dtype.itemsize * Nt * B * C
        + t_all.dtype.itemsize * out_tokens * B * C
        + 4 * out_tokens * Nt
    )
    cost = pl.CostEstimate(
        flops=flops, transcendentals=0, bytes_accessed=bytes_accessed
    )

    if C >= 128:
        # ---- Primary path: grid over (batch, C-chunks); no wrapper transposes. ----
        c_chunk = _pick_chunk(C, (2048, 1024, 512, 256, 128))
        num_c = C // c_chunk
        # v7x: make sure the parallel axes have at least 2 units of work.
        if B * num_c < 2 and c_chunk % 256 == 0:
            c_chunk //= 2
            num_c = C // c_chunk

        grid_spec = pltpu.PrefetchScalarGridSpec(
            num_scalar_prefetch=0,
            grid=(B, num_c),
            in_specs=[
                # Grid-invariant weight tile; Pallas elides re-fetch.
                pl.BlockSpec((out_tokens, Nt), lambda b, j: (0, 0)),
                # (1, Nt, c_chunk) block, batch dim squeezed -> kernel sees (Nt, c_chunk).
                pl.BlockSpec((None, Nt, c_chunk), lambda b, j: (b, 0, j)),
            ],
            out_specs=pl.BlockSpec(
                (None, out_tokens, c_chunk), lambda b, j: (b, 0, j)
            ),
        )
        return pl.pallas_call(
            _tran_up_kernel,
            out_shape=jax.ShapeDtypeStruct((B, out_tokens, C), t_all.dtype),
            grid_spec=grid_spec,
            compiler_params=pltpu.CompilerParams(
                dimension_semantics=("parallel", "parallel"),
                vmem_limit_bytes=32 * 1024 * 1024,
            ),
            cost_estimate=cost,
        )(w, t_all)

    # ---- Fallback path (C < 128): fold batch into the lane dim, pad to 128. ----
    BC = B * C
    pad_BC = ((BC + 127) // 128) * 128
    t2d = jnp.transpose(t_all, (1, 0, 2)).reshape(Nt, BC)      # (Nt, B*C)
    if pad_BC != BC:
        t2d = jnp.pad(t2d, ((0, 0), (0, pad_BC - BC)))
    lane = _pick_chunk(pad_BC, (8192, 4096, 2048, 1024, 512, 256, 128))
    num_chunks = pad_BC // lane

    grid_spec = pltpu.PrefetchScalarGridSpec(
        num_scalar_prefetch=0,
        grid=(num_chunks,),
        in_specs=[
            pl.BlockSpec((out_tokens, Nt), lambda j: (0, 0)),
            pl.BlockSpec((Nt, lane), lambda j: (0, j)),
        ],
        out_specs=pl.BlockSpec((out_tokens, lane), lambda j: (0, j)),
    )
    out2d = pl.pallas_call(
        _tran_up_kernel,
        out_shape=jax.ShapeDtypeStruct((out_tokens, pad_BC), t_all.dtype),
        grid_spec=grid_spec,
        compiler_params=pltpu.CompilerParams(
            dimension_semantics=("parallel",),
            vmem_limit_bytes=32 * 1024 * 1024,
        ),
        cost_estimate=cost,
    )(w, t2d)
    out2d = out2d[:, :BC]
    return jnp.transpose(out2d.reshape(out_tokens, B, C), (1, 0, 2))


def _reference_numpy(t_all: np.ndarray, Num: int) -> np.ndarray:
    """Direct (loop-free) port of the PyTorch forward for verification."""
    t_all = np.asarray(t_all, dtype=np.float32)
    t_seg = t_all[:, 0:1, :]
    t = t_all[:, 1:, :]
    B, N, C = t.shape
    s = int(np.sqrt(N))
    S = int(np.sqrt(Num - 1))
    t_img = np.transpose(t, (0, 2, 1)).reshape(B, C, s, s)
    w1d = _bilinear_matrix_1d(S, s)  # (S, s)
    # align_corners=True bilinear: out = Wy @ img @ Wx^T (separable)
    up = np.einsum("ij,bcjk,lk->bcil", w1d, t_img, w1d)
    t_up = up.reshape(B, C, S * S).transpose(0, 2, 1)
    return np.concatenate([t_seg, t_up], axis=1)


if __name__ == "__main__":
    s = 4                      # input patch grid side  -> N = 16 spatial tokens
    S = 8                      # output patch grid side
    Num = S * S + 1            # 65 output tokens (incl. class token)
    Nt = s * s + 1             # 17 input tokens  (incl. class token)

    key = jax.random.PRNGKey(0)

    # --- Primary path: C >= 128, no wrapper-side transposes ---
    B1, C1 = 2, 128
    t1 = jax.random.normal(key, (B1, Nt, C1), dtype=jnp.float32)
    out1 = jax.block_until_ready(tran_up(t1, Num))
    ref1 = _reference_numpy(np.asarray(t1), Num)
    assert out1.shape == (B1, Num, C1), out1.shape
    np.testing.assert_allclose(np.asarray(out1), ref1, rtol=1e-5, atol=1e-5)

    # --- Fallback path: C < 128, batch folded into the lane dim ---
    B2, C2 = 4, 32             # B*C = 128 -> lane-dense after fold
    t2 = jax.random.normal(jax.random.PRNGKey(0), (B2, Nt, C2), dtype=jnp.float32)
    out2 = jax.block_until_ready(tran_up(t2, Num))
    ref2 = _reference_numpy(np.asarray(t2), Num)
    assert out2.shape == (B2, Num, C2), out2.shape
    np.testing.assert_allclose(np.asarray(out2), ref2, rtol=1e-5, atol=1e-5)

    # --- bf16 activations, f32 weights & accumulation (primary path) ---
    t1_bf16 = t1.astype(jnp.bfloat16)
    out_bf16 = jax.block_until_ready(tran_up(t1_bf16, Num))
    ref_bf16 = _reference_numpy(np.asarray(t1_bf16, dtype=np.float32), Num)
    assert out_bf16.shape == (B1, Num, C1), out_bf16.shape
    np.testing.assert_allclose(
        np.asarray(out_bf16, dtype=np.float32), ref_bf16, rtol=2e-2, atol=2e-2
    )

    print("KERNEL_OK")
</pallas_src>

<mosaic_0001>
module attributes {stable_mosaic.version = 11 : i64} {
  func.func @_tran_up_kernel(%arg0: i32, %arg1: i32, %arg2: memref<65x17xf32, #tpu.memory_space<vmem>>, %arg3: memref<1x17x128xf32, #tpu.memory_space<vmem>>, %arg4: memref<1x65x128xf32, #tpu.memory_space<vmem>>) attributes {dimension_semantics = [#tpu.dimension_semantics<parallel>, #tpu.dimension_semantics<parallel>], iteration_bounds = array<i64: 2, 1>, scalar_prefetch = 0 : i64, scratch_operands = 0 : i64, tpu.core_type = #tpu.core_type<tc>, window_params = [{pipeline_mode = #tpu.pipeline_mode<synchronous>, transform_indices = @transform_0, window_bounds = array<i64: 65, 17>}, {transform_indices = @transform_1, window_bounds = array<i64: 1, 17, 128>}, {transform_indices = @transform_2, window_bounds = array<i64: 1, 65, 128>}]} {
    %c0 = arith.constant 0 : index
    %c0_0 = arith.constant 0 : index
    %c0_1 = arith.constant 0 : index
    %0 = vector.load %arg3[%c0, %c0_0, %c0_1] : memref<1x17x128xf32, #tpu.memory_space<vmem>>, vector<1x17x128xf32>
    %1 = vector.shape_cast %0 : vector<1x17x128xf32> to vector<17x128xf32>
    %c0_2 = arith.constant 0 : index
    %c0_3 = arith.constant 0 : index
    %2 = vector.load %arg2[%c0_2, %c0_3] : memref<65x17xf32, #tpu.memory_space<vmem>>, vector<65x17xf32>
    %cst = arith.constant dense<0.000000e+00> : vector<65x128xf32>
    %3 = tpu.matmul %2, %1, %cst {dimension_numbers = #tpu.dot_dimension_numbers<[1], [0], [0], [1], [0, 0, 1, 1], [], []>} : vector<65x17xf32>, vector<17x128xf32>, vector<65x128xf32> -> vector<65x128xf32>
    %c0_4 = arith.constant 0 : index
    %c0_5 = arith.constant 0 : index
    %c0_6 = arith.constant 0 : index
    %4 = vector.load %arg4[%c0_4, %c0_5, %c0_6] : memref<1x65x128xf32, #tpu.memory_space<vmem>>, vector<1x65x128xf32>
    %5 = vector.shape_cast %4 : vector<1x65x128xf32> to vector<65x128xf32>
    %6 = vector.shape_cast %3 : vector<65x128xf32> to vector<1x65x128xf32>
    tpu.vector_store %arg4[%c0_4, %c0_5, %c0_6], %6 {strides = array<i32>} : memref<1x65x128xf32, #tpu.memory_space<vmem>>, vector<1x65x128xf32>,
    return
  }
  func.func @transform_0(%arg0: i32, %arg1: i32) -> (i32, i32) {
    %c0_i32 = arith.constant 0 : i32
    %c0_i32_0 = arith.constant 0 : i32
    %c0_i32_1 = arith.constant 0 : i32
    return %c0_i32, %c0_i32_0 : i32, i32
  }
  func.func @transform_1(%arg0: i32, %arg1: i32) -> (i32, i32, i32) {
    %c0_i32 = arith.constant 0 : i32
    %c0_i32_0 = arith.constant 0 : i32
    return %arg0, %c0_i32, %arg1 : i32, i32, i32
  }
  func.func @transform_2(%arg0: i32, %arg1: i32) -> (i32, i32, i32) {
    %c0_i32 = arith.constant 0 : i32
    %c0_i32_0 = arith.constant 0 : i32
    return %arg0, %c0_i32, %arg1 : i32, i32, i32
  }
}

</mosaic_0001>

<bundles_post_ra>
// kernel: tpu_custom_call.1
= control target key start
LH: loop header
LB: loop body
LE: loop exit
PB: predicated region body
PF: predicated region fallthrough
CT: control target
= control target key end

     0   :  { %s563_s9 = smov 0   ;;  %s565_s10 = smov 0   ;;  %s645_s0 = inlined_call_operand.vmem [shape: f32[65,17], index: 0, kind: input, shape index: {}]   ;;  %s646_s1 = inlined_call_operand.vmem [shape: f32[2,17,128], index: 1, kind: input, shape index: {}]   ;;  %s647_s2 = inlined_call_operand.vmem [shape: f32[2,65,128], index: 2, kind: output, shape index: {}]  }
   0x1   :  { %s567_s11 = smov 0  }
   0x2 LB: > { %s24_s12 = sadd.s32 1, %s539_s10  ;;  %p425_p0 = scmp.ge.s32.totalorder %s543_s11, 1  ;;  %s543_s11 = sphi %s567_s11, %s12_s11   ;;  %s539_s10 = sphi %s565_s10, %s649_s10   ;;  %s535_s9 = sphi %s563_s9, %s648_s9  }
   0x3   : > { %p26_p1 = scmp.ge.s32.totalorder %s24_s12, 2  ;;  %p131_p2 = scmp.lt.s32.totalorder %s543_s11, 3 }
   0x5   : > { %s651_s12 = smov (%p26_p1, %s24_s12), 0  ;;  %p132_p3 = pnand %p425_p0, %p131_p2 }
   0x6   : > { %p159_p4 = scmp.lt.s32.totalorder (!%p132_p3), %s535_s9, 1  ;;  %v545_v0 = vmov (!%p132_p3), 0.0|0.0   ;;  %vm546_vm0 = vmmov (!%p132_p3), 0   ;;  %v547_v1 = vmov (!%p132_p3), 0.0   ;;  %vm215_vm1 = vcmask (!%p132_p3), 1040384   ;;  %v178_v6 = vld [vmem:[%s645_s0] sm:$0xff] (!%p132_p3) }
   0x7   : > { %135 = sbr.rel (%p132_p3) target bundleno = 255 (0xff), region = 28  ;;  %485 = vmatprep.subr.bf16.mxu0 (!%p132_p3), %v545_v0  ;;  %488 = vmatprep.subr.bf16.mxu1 (!%p132_p3), %v545_v0  ;;  %vm187_vm2 = vcmask (!%p132_p3), 138240   ;;  %v183_v7 = vld [vmem:[%s645_s0 + $0x28] sm:$0xff] (!%p132_p3)  ;;  %v184_v9 = vld [vmem:[%s645_s0 + $0x30] sm:$0xff] (!%p132_p3)  ;;  %v185_v11 = vld [vmem:[%s645_s0 + $0x38] sm:$0xff] (!%p132_p3) }
   0x8   : > { %458 = vmatprep.mubr.msk.f32.mxu0 (!%p132_p3), %vm546_vm0, %v547_v1  ;;  %473 = vmatprep.mubr.msk.f32.mxu1 (!%p132_p3), %vm546_vm0, %v547_v1  ;;  %v179_v8 = vld [vmem:[%s645_s0 + $0x8] sm:$0xff] (!%p132_p3)  ;;  %v180_v10 = vld [vmem:[%s645_s0 + $0x10] sm:$0xff] (!%p132_p3)  ;;  %v181_v12 = vld [vmem:[%s645_s0 + $0x18] sm:$0xff] (!%p132_p3) }
   0x9   : > { %v186_v13 = vld [vmem:[%s645_s0 + $0x40] sm:$0x1] (!%p132_p3) }
   0xa   : > { %v182_v14 = vld [vmem:[%s645_s0 + $0x20] sm:$0xff] (!%p132_p3) }
   0xe   : > { %s653_s9 = smov (!%p159_p4, %s535_s9), 1 }
   0xf   : > { %s492_s13 = smul.u32 24, %s653_s9 }
  0x10   : > { %s493_s7 = smul.u32 72, %s653_s9 }
  0x11   : > { %s166_s16 = scalar_lea.vmem %s646_s1, %s492_s13 }
  0x12   : > { %v175_v2 = vld [vmem:[%s166_s16] sm:$0xff]  ;;  %v176_v3 = vld [vmem:[%s166_s16 + $0x8] sm:$0xff]  ;;  %v177_v5 = vld [vmem:[%s166_s16 + $0x10] sm:$0x1]  ;;  %s174_s14 = scalar_lea.vmem %s647_s2, %s493_s7 }
  0x13   : > { %v486_v4 = vpack.c.bf16 %v176_v3, %v175_v2 }
  0x15   : > { %487 = vmatpush3.bf16.msra.mxu0 %v486_v4  ;;  %490 = vmatpush3.bf16.msra.mxu1 %v486_v4 }
  0x16   : > { %456 = vmatprep.subr.mxu0 %v547_v1  ;;  %489 = vmatprep.subr.mxu1 %v547_v1 }
  0x19   : > { %457 = vmatpush3.msk.msra.mxu0 %vm215_vm1, %v177_v5  ;;  %491 = vmatpush3.msk.msra.mxu1 %vm215_vm1, %v177_v5 }
  0x1a   : > { %459 = vmatmul.mubr.msk.f32.vlgmr.msra.gmra.mrb[0].mxu0 %vm187_vm2, %v178_v6  ;;  %474 = vmatmul.mubr.msk.f32.vlgmr.msra.gmra.mrb[0].mxu1 %vm187_vm2, %v183_v7 }
  0x1b   : > { %461 = vmatprep.mubr.msk.f32.mxu0 %vm546_vm0, %v547_v1  ;;  %476 = vmatprep.mubr.msk.f32.mxu1 %vm546_vm0, %v547_v1 }
  0x1e   : > { %462 = vmatmul.mubr.msk.f32.gmra.mrb[2].mxu0 %vm187_vm2, %v179_v8  ;;  %477 = vmatmul.mubr.msk.f32.gmra.mrb[2].mxu1 %vm187_vm2, %v184_v9 }
  0x1f   : > { %464 = vmatprep.mubr.msk.f32.mxu0 %vm546_vm0, %v547_v1  ;;  %479 = vmatprep.mubr.msk.f32.mxu1 %vm546_vm0, %v547_v1 }
  0x22   : > { %465 = vmatmul.mubr.msk.f32.gmra.mrb[4].mxu0 %vm187_vm2, %v180_v10  ;;  %480 = vmatmul.mubr.msk.f32.gmra.mrb[4].mxu1 %vm187_vm2, %v185_v11 }
  0x23   : > { %467 = vmatprep.mubr.msk.f32.mxu0 %vm546_vm0, %v547_v1  ;;  %482 = vmatprep.mubr.msk.f32.mxu1 %vm546_vm0, %v547_v1 }
  0x26   : > { %468 = vmatmul.mubr.msk.f32.gmra.mrb[6].mxu0 %vm187_vm2, %v181_v12  ;;  %483 = vmatmul.mubr.msk.f32.gmra.mrb[6].mxu1 %vm187_vm2, %v186_v13 }
  0x27   : > { %470 = vmatprep.mubr.msk.f32.mxu0 %vm546_vm0, %v547_v1 }
  0x2a   : > { %471 = vmatmul.mubr.msk.f32.gmra.mrb[8].mxu0 %vm187_vm2, %v182_v14 }
  0xed   : > { %v285_v15 = vpop.f32.mrb[0].mxu0  ;;  %v310_v16 = vpop.f32.mrb[0].mxu1 }
  0xee   : > { %329 = vst [vmem:[%s174_s14] sm:$0xff] %v285_v15  ;;  %v460_v17 = vpop.f32.mrb[1].mxu0  ;;  %334 = vst [vmem:[%s174_s14 + $0x28] sm:$0xff] %v310_v16  ;;  %v475_v18 = vpop.f32.mrb[1].mxu1 }
  0xf1   : > { %v290_v19 = vpop.f32.mrb[2].mxu0  ;;  %v315_v20 = vpop.f32.mrb[2].mxu1 }
  0xf2   : > { %330 = vst [vmem:[%s174_s14 + $0x8] sm:$0xff] %v290_v19  ;;  %v463_v21 = vpop.f32.mrb[3].mxu0  ;;  %335 = vst [vmem:[%s174_s14 + $0x30] sm:$0xff] %v315_v20  ;;  %v478_v22 = vpop.f32.mrb[3].mxu1 }
  0xf5   : > { %v295_v23 = vpop.f32.mrb[4].mxu0  ;;  %v320_v24 = vpop.f32.mrb[4].mxu1 }
  0xf6   : > { %331 = vst [vmem:[%s174_s14 + $0x10] sm:$0xff] %v295_v23  ;;  %v466_v25 = vpop.f32.mrb[5].mxu0  ;;  %336 = vst [vmem:[%s174_s14 + $0x38] sm:$0xff] %v320_v24  ;;  %v481_v26 = vpop.f32.mrb[5].mxu1 }
  0xf9   : > { %v300_v27 = vpop.f32.mrb[6].mxu0  ;;  %v325_v28 = vpop.f32.mrb[6].mxu1 }
  0xfa   : > { %332 = vst [vmem:[%s174_s14 + $0x18] sm:$0xff] %v300_v27  ;;  %v469_v29 = vpop.f32.mrb[7].mxu0  ;;  %337 = vst [vmem:[%s174_s14 + $0x40] sm:$0x1] %v325_v28  ;;  %v484_v30 = vpop.f32.mrb[7].mxu1 }
  0xfd   : > { %v305_v31 = vpop.f32.mrb[8].mxu0 }
  0xfe   : > { %333 = vst [vmem:[%s174_s14 + $0x20] sm:$0xff] %v305_v31  ;;  %v472_v32 = vpop.f32.mrb[9].mxu0 }
  0xff PF: > { %s12_s11 = sadd.s32 1, %s543_s11   ;;  %s648_s9 = smov %s539_s10 }
 0x100   : > { %p9_p5 = scmp.ge.s32.totalorder %s12_s11, 4   ;;  %s649_s10 = smov %s651_s12 }
 0x102   :  { %11 = sbr.rel (!%p9_p5) target bundleno = 2 (0x2), region = 58 }

</bundles_post_ra>
